<compile_context>
chip_gen: v7x
topology: tpu7x:2x2x1
jax: 0.10.0
libtpu: 0.0.40
codegen_flags: <defaults>
</compile_context>

<pallas_src>
import math
from functools import partial

import numpy as np
import jax
import jax.numpy as jnp
from jax import lax
from jax.experimental import pallas as pl
from jax.experimental.pallas import tpu as pltpu

LAYERS = (3, 4, 23, 3)   # se_resnext101_32x4d block counts
PLANES = (64, 128, 256, 512)
STRIDES = (1, 2, 2, 2)
GROUPS = 32
REDUCTION = 16
BN_EPS = 1e-5

VMEM_LIMIT = 48 * 1024 * 1024     # <= v7x 64 MiB physical; plenty of headroom on v5e/v6e
MAX_PATCH_TILE_BYTES = 8 * 1024 * 1024


def _round_up(v, m):
    return -(-v // m) * m


# -----------------------------------------------------------------------------
# Pallas kernels
# -----------------------------------------------------------------------------
def _conv_mm_kernel(p_ref, w_ref, s_ref, b_ref, o_ref, *, relu, num_sup):
    # p_ref : (tm, Ktot)        bf16 im2col patches, group-major along lanes
    # w_ref : (Ktot, cs)        bf16 weights; rows s*ks:(s+1)*ks hold super-group s's
    #                           block-diagonal weight, columns = its 128 output channels
    #                           (num_sup == 1: plain dense (K, Cout) weight)
    # s_ref, b_ref : (1, Cout)  f32 folded BatchNorm scale / shift
    # o_ref : (tm, Cout)        bf16 lane-dense output tile
    ks = w_ref.shape[0] // num_sup           # contraction rows per super-group
    cs = w_ref.shape[1]                      # output lanes per super-group (128, or Cout)
    for s in range(num_sup):                 # unrolled; <= 8 lane-dense MXU dots
        acc = jnp.dot(p_ref[:, s * ks:(s + 1) * ks], w_ref[s * ks:(s + 1) * ks, :],
                      preferred_element_type=jnp.float32)
        y = acc * s_ref[:, s * cs:(s + 1) * cs] + b_ref[:, s * cs:(s + 1) * cs]
        if relu:
            y = jnp.maximum(y, 0.0)
        o_ref[:, s * cs:(s + 1) * cs] = y.astype(o_ref.dtype)   # 128-lane aligned store


def _se_gate_kernel(x_ref, w1_ref, b1_ref, w2_ref, b2_ref, g_ref, sum_ref, *, inv_hw):
    # x_ref: (1, thw, C) bf16 ; w1: (C, Cr) ; w2: (Cr, C) ; g_ref: (1, 1, C) f32
    i = pl.program_id(1)

    @pl.when(i == 0)
    def _():
        sum_ref[...] = jnp.zeros_like(sum_ref)

    sum_ref[...] += jnp.sum(x_ref[0].astype(jnp.float32), axis=0, keepdims=True)

    @pl.when(i == pl.num_programs(1) - 1)
    def _():
        pooled = (sum_ref[...] * inv_hw).astype(jnp.bfloat16)          # AdaptiveAvgPool2d(1)
        z = jnp.dot(pooled, w1_ref[...],
                    preferred_element_type=jnp.float32) + b1_ref[...]
        z = jnp.maximum(z, 0.0).astype(jnp.bfloat16)                   # ReLU
        g = jnp.dot(z, w2_ref[...],
                    preferred_element_type=jnp.float32) + b2_ref[...]
        g_ref[0] = pl.reciprocal(1.0 + jnp.exp(-g), approx=True)       # sigmoid (EUP recip)


def _se_apply_kernel(x_ref, r_ref, g_ref, o_ref):
    # x_ref, r_ref: (1, thw, C) bf16 ; g_ref: (1, 1, C) f32 ; o_ref: (1, thw, C) bf16
    y = x_ref[...].astype(jnp.float32) * g_ref[...] + r_ref[...].astype(jnp.float32)
    o_ref[...] = jnp.maximum(y, 0.0).astype(o_ref.dtype)               # SE*x + residual, ReLU


def _head_kernel(x_ref, w_ref, b_ref, o_ref, *, inv_hw):
    # x_ref: (N, HW, C) bf16 ; w: (C, num_classes) bf16 ; out f32
    pooled = (jnp.sum(x_ref[...].astype(jnp.float32), axis=1) * inv_hw).astype(jnp.bfloat16)
    o_ref[...] = jnp.dot(pooled, w_ref[...],
                         preferred_element_type=jnp.float32) + b_ref[...]


# -----------------------------------------------------------------------------
# Wrappers (glue: im2col / weight packing; hot path in Pallas)
# -----------------------------------------------------------------------------
@partial(jax.jit, static_argnames=("stride", "pad", "groups", "relu"))
def conv2d_bn_act(x, w, scale, shift, *, stride, pad, groups, relu):
    """x: (N,H,W,C) bf16 NHWC.  w: (Cout, Cin//groups, kh, kw) f32 (PyTorch layout)."""
    N, H, W, C = x.shape
    Cout, Cg, kh, kw = w.shape
    G = groups
    Kg = Cg * kh * kw
    Ktot = G * Kg
    x = x.astype(jnp.bfloat16)

    if kh == 1 and kw == 1 and pad == 0:
        xs = x[:, ::stride, ::stride, :] if stride > 1 else x
        Ho, Wo = xs.shape[1], xs.shape[2]
        p = xs.reshape(N * Ho * Wo, Ktot)
    else:
        if pad:
            x = jnp.pad(x, ((0, 0), (pad, pad), (pad, pad), (0, 0)))
        Hp, Wp = H + 2 * pad, W + 2 * pad
        Ho = (Hp - kh) // stride + 1
        Wo = (Wp - kw) // stride + 1
        # TODO(synk): im2col stays in XLA glue; in-kernel halo-DMA im2col would cut HBM reads
        #             further for the 3x3 convs.
        cols = []
        for ky in range(kh):
            for kx in range(kw):
                cols.append(
                    x[:, ky:ky + stride * Ho:stride, kx:kx + stride * Wo:stride, :]
                    .reshape(N, Ho, Wo, G, 1, Cg))
        p = jnp.concatenate(cols, axis=4).reshape(N * Ho * Wo, Ktot)   # (g, tap, cg) lane order

    M = N * Ho * Wo
    tm = 512
    while tm > 128 and tm * Ktot * 2 > MAX_PATCH_TILE_BYTES:
        tm //= 2                                   # keep the bf16 patch tile <= 8 MiB
    if M < tm:
        tm = _round_up(M, 8)
    Mp = _round_up(M, tm)
    if Mp != M:
        p = jnp.pad(p, ((0, Mp - M), (0, 0)))

    # ---- weight packing ------------------------------------------------------
    if G == 1:
        # dense (K, Cout): rows in (ky, kx, cin) order, matching the patch lane order.
        wd = w.transpose(2, 3, 1, 0).reshape(Kg, Cout).astype(jnp.bfloat16)
        num_sup = 1
    else:
        # Pack groups into super-groups with a joint 128-lane output width.  Each super-group
        # weight is block-diagonal (sg*Kg, sg*Ng); super-groups are stacked along rows.
        Ng = Cout // G
        sg = min(G, max(1, 128 // Ng))
        if G % sg != 0:
            sg = 1                                  # safe fallback (not hit for this net)
        num_sup = G // sg
        wg = (w.reshape(G, Ng, Cg, kh, kw)
               .transpose(0, 3, 4, 2, 1)            # (G, kh, kw, Cg, Ng)
               .reshape(num_sup, sg, Kg, Ng))
        eye = jnp.eye(sg, dtype=w.dtype)
        wb = jnp.einsum('sjkn,jl->sjkln', wg, eye)  # block-diag within each super-group
        wd = wb.reshape(num_sup * sg * Kg, sg * Ng).astype(jnp.bfloat16)

    s_ = scale.reshape(1, Cout).astype(jnp.float32)
    b_ = shift.reshape(1, Cout).astype(jnp.float32)

    out = pl.pallas_call(
        partial(_conv_mm_kernel, relu=relu, num_sup=num_sup),
        out_shape=jax.ShapeDtypeStruct((Mp, Cout), jnp.bfloat16),
        grid=(Mp // tm,),
        in_specs=[
            pl.BlockSpec((tm, Ktot), lambda i: (i, 0)),
            pl.BlockSpec(wd.shape, lambda i: (0, 0)),
            pl.BlockSpec((1, Cout), lambda i: (0, 0)),
            pl.BlockSpec((1, Cout), lambda i: (0, 0)),
        ],
        out_specs=pl.BlockSpec((tm, Cout), lambda i: (i, 0)),
        compiler_params=pltpu.CompilerParams(
            dimension_semantics=("parallel",),
            vmem_limit_bytes=VMEM_LIMIT),
    )(p, wd, s_, b_)

    return out[:M].reshape(N, Ho, Wo, Cout)


@jax.jit
def se_residual_relu(x, residual, w1, b1, w2, b2):
    N, H, W, C = x.shape
    HW = H * W
    Cr = w1.shape[1]
    cap = max(8, ((512 * 1024) // C) // 8 * 8)       # cap tile elements -> bounded VMEM
    thw = HW if HW <= cap else cap
    HWp = _round_up(HW, thw)
    n_hw = HWp // thw

    xf = x.reshape(N, HW, C).astype(jnp.bfloat16)
    rf = residual.reshape(N, HW, C).astype(jnp.bfloat16)
    if HWp != HW:
        xf = jnp.pad(xf, ((0, 0), (0, HWp - HW), (0, 0)))
        rf = jnp.pad(rf, ((0, 0), (0, HWp - HW), (0, 0)))

    gate = pl.pallas_call(
        partial(_se_gate_kernel, inv_hw=1.0 / HW),
        out_shape=jax.ShapeDtypeStruct((N, 1, C), jnp.float32),
        grid=(N, n_hw),
        in_specs=[
            pl.BlockSpec((1, thw, C), lambda n, i: (n, i, 0)),
            pl.BlockSpec((C, Cr), lambda n, i: (0, 0)),
            pl.BlockSpec((1, Cr), lambda n, i: (0, 0)),
            pl.BlockSpec((Cr, C), lambda n, i: (0, 0)),
            pl.BlockSpec((1, C), lambda n, i: (0, 0)),
        ],
        out_specs=pl.BlockSpec((1, 1, C), lambda n, i: (n, 0, 0)),
        scratch_shapes=[pltpu.VMEM((1, C), jnp.float32)],
        compiler_params=pltpu.CompilerParams(
            dimension_semantics=("parallel", "arbitrary"),
            vmem_limit_bytes=VMEM_LIMIT),
    )(xf, w1.astype(jnp.bfloat16), b1.reshape(1, Cr).astype(jnp.float32),
      w2.astype(jnp.bfloat16), b2.reshape(1, C).astype(jnp.float32))

    out = pl.pallas_call(
        _se_apply_kernel,
        out_shape=jax.ShapeDtypeStruct((N, HWp, C), jnp.bfloat16),
        grid=(N, n_hw),
        in_specs=[
            pl.BlockSpec((1, thw, C), lambda n, i: (n, i, 0)),
            pl.BlockSpec((1, thw, C), lambda n, i: (n, i, 0)),
            pl.BlockSpec((1, 1, C), lambda n, i: (n, 0, 0)),
        ],
        out_specs=pl.BlockSpec((1, thw, C), lambda n, i: (n, i, 0)),
        compiler_params=pltpu.CompilerParams(
            dimension_semantics=("parallel", "parallel"),
            vmem_limit_bytes=VMEM_LIMIT),
    )(xf, rf, gate)

    if HWp != HW:
        out = out[:, :HW]
    return out.reshape(N, H, W, C)


@jax.jit
def avgpool_linear(x, w, b):
    N, H, W, C = x.shape
    HW = H * W
    ncls = w.shape[1]
    return pl.pallas_call(
        partial(_head_kernel, inv_hw=1.0 / HW),
        out_shape=jax.ShapeDtypeStruct((N, ncls), jnp.float32),
        grid=(1,),
        in_specs=[
            pl.BlockSpec((N, HW, C), lambda i: (0, 0, 0)),
            pl.BlockSpec((C, ncls), lambda i: (0, 0)),
            pl.BlockSpec((1, ncls), lambda i: (0, 0)),
        ],
        out_specs=pl.BlockSpec((N, ncls), lambda i: (0, 0)),
        compiler_params=pltpu.CompilerParams(vmem_limit_bytes=VMEM_LIMIT),
    )(x.reshape(N, HW, C).astype(jnp.bfloat16), w.astype(jnp.bfloat16),
      b.reshape(1, ncls).astype(jnp.float32))


def maxpool2d_ceil(x, k=3, s=2):
    # TODO(synk): MaxPool2d(3, stride=2, ceil_mode=True) stays in plain-JAX glue (tiny op);
    #             ceil_mode window-drop rule validated for the shapes used here.
    N, H, W, C = x.shape
    dt = x.dtype
    Ho = -((H - k) // -s) + 1
    Wo = -((W - k) // -s) + 1
    ph = (Ho - 1) * s + k - H
    pw = (Wo - 1) * s + k - W
    xf = x.astype(jnp.float32)
    xp = jnp.pad(xf, ((0, 0), (0, ph), (0, pw), (0, 0)), constant_values=-jnp.inf)
    out = lax.reduce_window(xp, -jnp.inf, lax.max, (1, k, k, 1), (1, s, s, 1), "VALID")
    return out.astype(dt)


# -----------------------------------------------------------------------------
# Deterministic synthetic parameters (shapes exactly as in se_resnext101_32x4d)
# -----------------------------------------------------------------------------
class ParamGen:
    def __init__(self, seed):
        self.rng = np.random.RandomState(seed)

    def conv(self, cout, cin_g, kh, kw):
        fan_in = cin_g * kh * kw
        w = self.rng.randn(cout, cin_g, kh, kw).astype(np.float32) * math.sqrt(2.0 / fan_in)
        return jnp.asarray(w)

    def bn(self, c):
        gamma = 1.0 + 0.1 * self.rng.randn(c).astype(np.float32)
        beta = 0.1 * self.rng.randn(c).astype(np.float32)
        rmean = 0.1 * self.rng.randn(c).astype(np.float32)
        rvar = 1.0 + 0.1 * np.abs(self.rng.randn(c).astype(np.float32))
        scale = gamma / np.sqrt(rvar + BN_EPS)
        shift = beta - rmean * scale
        return jnp.asarray(scale), jnp.asarray(shift)

    def linear(self, cin, cout):
        w = self.rng.randn(cin, cout).astype(np.float32) * math.sqrt(1.0 / cin)
        b = 0.01 * self.rng.randn(cout).astype(np.float32)
        return jnp.asarray(w), jnp.asarray(b)


def build_params(seed=0):
    pg = ParamGen(seed)
    params = {"stem_conv": pg.conv(64, 3, 7, 7), "stem_bn": pg.bn(64)}
    blocks = []
    inplanes = 64
    for planes, nblocks, stride in zip(PLANES, LAYERS, STRIDES):
        width = (planes * 4 // 64) * GROUPS          # base_width = 4
        outp = planes * 4                            # expansion = 4
        for bi in range(nblocks):
            s = stride if bi == 0 else 1
            p = {
                "conv1": pg.conv(width, inplanes, 1, 1), "bn1": pg.bn(width),
                "conv2": pg.conv(width, width // GROUPS, 3, 3), "bn2": pg.bn(width),
                "conv3": pg.conv(outp, width, 1, 1), "bn3": pg.bn(outp),
                "stride": s,
            }
            cr = outp // REDUCTION
            p["se_w1"], p["se_b1"] = pg.linear(outp, cr)
            p["se_w2"], p["se_b2"] = pg.linear(cr, outp)
            if bi == 0:                              # downsample: 1x1 conv stride s + BN
                p["down_conv"] = pg.conv(outp, inplanes, 1, 1)
                p["down_bn"] = pg.bn(outp)
            blocks.append(p)
            inplanes = outp
    params["blocks"] = blocks
    params["fc_w"], params["fc_b"] = pg.linear(2048, 2)   # last_linear = Linear(2048, 2)
    return params


# -----------------------------------------------------------------------------
# Forward pass
# -----------------------------------------------------------------------------
def bottleneck(x, p):
    out = conv2d_bn_act(x, p["conv1"], p["bn1"][0], p["bn1"][1],
                        stride=1, pad=0, groups=1, relu=True)
    out = conv2d_bn_act(out, p["conv2"], p["bn2"][0], p["bn2"][1],
                        stride=p["stride"], pad=1, groups=GROUPS, relu=True)
    out = conv2d_bn_act(out, p["conv3"], p["bn3"][0], p["bn3"][1],
                        stride=1, pad=0, groups=1, relu=False)
    if "down_conv" in p:
        residual = conv2d_bn_act(x, p["down_conv"], p["down_bn"][0], p["down_bn"][1],
                                 stride=p["stride"], pad=0, groups=1, relu=False)
    else:
        residual = x
    return se_residual_relu(out, residual, p["se_w1"], p["se_b1"], p["se_w2"], p["se_b2"])


def se_resnext101_32x4d_forward(x_nchw, params):
    x = jnp.transpose(x_nchw, (0, 2, 3, 1)).astype(jnp.bfloat16)   # NCHW -> NHWC, bf16 activations
    # layer0: 7x7/2 conv + BN + ReLU + MaxPool(3, 2, ceil_mode=True)
    x = conv2d_bn_act(x, params["stem_conv"], params["stem_bn"][0], params["stem_bn"][1],
                      stride=2, pad=3, groups=1, relu=True)
    x = maxpool2d_ceil(x, 3, 2)
    # layer1..layer4: SEResNeXtBottleneck blocks [3, 4, 23, 3]
    for p in params["blocks"]:
        x = bottleneck(x, p)
    # logits: adaptive avg pool (1,1) + flatten + Linear(2048, 2)
    return avgpool_linear(x, params["fc_w"], params["fc_b"])


if __name__ == "__main__":
    key = jax.random.PRNGKey(0)
    x = jax.random.normal(key, (2, 3, 64, 64), jnp.float32)        # NCHW, like the PyTorch module
    params = build_params(seed=0)
    logits = se_resnext101_32x4d_forward(x, params)
    logits = jax.block_until_ready(logits)
    assert logits.shape == (2, 2)
    assert bool(jnp.all(jnp.isfinite(logits)))
    print("KERNEL_OK")
</pallas_src>

<mosaic_0001>
module attributes {stable_mosaic.version = 11 : i64} {
  func.func @_conv_mm_kernel(%arg0: i32, %arg1: memref<512x147xbf16, #tpu.memory_space<vmem>>, %arg2: memref<147x64xbf16, #tpu.memory_space<vmem>>, %arg3: memref<1x64xf32, #tpu.memory_space<vmem>>, %arg4: memref<1x64xf32, #tpu.memory_space<vmem>>, %arg5: memref<512x64xbf16, #tpu.memory_space<vmem>>) attributes {dimension_semantics = [#tpu.dimension_semantics<parallel>], iteration_bounds = array<i64: 4>, scalar_prefetch = 0 : i64, scratch_operands = 0 : i64, tpu.core_type = #tpu.core_type<tc>, window_params = [{transform_indices = @transform_0, window_bounds = array<i64: 512, 147>}, {pipeline_mode = #tpu.pipeline_mode<synchronous>, transform_indices = @transform_1, window_bounds = array<i64: 147, 64>}, {pipeline_mode = #tpu.pipeline_mode<synchronous>, transform_indices = @transform_2, window_bounds = array<i64: 1, 64>}, {pipeline_mode = #tpu.pipeline_mode<synchronous>, transform_indices = @transform_3, window_bounds = array<i64: 1, 64>}, {transform_indices = @transform_4, window_bounds = array<i64: 512, 64>}]} {
    %c0 = arith.constant 0 : index
    %c0_0 = arith.constant 0 : index
    %0 = vector.load %arg1[%c0, %c0_0] : memref<512x147xbf16, #tpu.memory_space<vmem>>, vector<512x147xbf16>
    %c0_1 = arith.constant 0 : index
    %c0_2 = arith.constant 0 : index
    %1 = vector.load %arg2[%c0_1, %c0_2] : memref<147x64xbf16, #tpu.memory_space<vmem>>, vector<147x64xbf16>
    %cst = arith.constant dense<0.000000e+00> : vector<512x64xf32>
    %2 = tpu.matmul %0, %1, %cst {dimension_numbers = #tpu.dot_dimension_numbers<[1], [0], [0], [1], [0, 0, 1, 1], [], []>} : vector<512x147xbf16>, vector<147x64xbf16>, vector<512x64xf32> -> vector<512x64xf32>
    %c0_3 = arith.constant 0 : index
    %c0_4 = arith.constant 0 : index
    %3 = vector.load %arg3[%c0_3, %c0_4] : memref<1x64xf32, #tpu.memory_space<vmem>>, vector<1x64xf32>
    %4 = vector.broadcast %3 : vector<1x64xf32> to vector<512x64xf32>
    %5 = arith.mulf %2, %4 : vector<512x64xf32>
    %c0_5 = arith.constant 0 : index
    %c0_6 = arith.constant 0 : index
    %6 = vector.load %arg4[%c0_5, %c0_6] : memref<1x64xf32, #tpu.memory_space<vmem>>, vector<1x64xf32>
    %7 = vector.broadcast %6 : vector<1x64xf32> to vector<512x64xf32>
    %8 = arith.addf %5, %7 : vector<512x64xf32>
    %cst_7 = arith.constant 0.000000e+00 : f32
    %9 = vector.broadcast %cst_7 : f32 to vector<512x64xf32>
    %10 = arith.maximumf %8, %9 : vector<512x64xf32>
    %11 = arith.truncf %10 : vector<512x64xf32> to vector<512x64xbf16>
    %c0_8 = arith.constant 0 : index
    %c0_9 = arith.constant 0 : index
    %12 = vector.load %arg5[%c0_8, %c0_9] : memref<512x64xbf16, #tpu.memory_space<vmem>>, vector<512x64xbf16>
    tpu.vector_store %arg5[%c0_8, %c0_9], %11 {strides = array<i32>} : memref<512x64xbf16, #tpu.memory_space<vmem>>, vector<512x64xbf16>,
    return
  }
  func.func @transform_0(%arg0: i32) -> (i32, i32) {
    %c0_i32 = arith.constant 0 : i32
    %c0_i32_0 = arith.constant 0 : i32
    return %arg0, %c0_i32 : i32, i32
  }
  func.func @transform_1(%arg0: i32) -> (i32, i32) {
    %c0_i32 = arith.constant 0 : i32
    %c0_i32_0 = arith.constant 0 : i32
    %c0_i32_1 = arith.constant 0 : i32
    return %c0_i32, %c0_i32_0 : i32, i32
  }
  func.func @transform_2(%arg0: i32) -> (i32, i32) {
    %c0_i32 = arith.constant 0 : i32
    %c0_i32_0 = arith.constant 0 : i32
    %c0_i32_1 = arith.constant 0 : i32
    return %c0_i32, %c0_i32_0 : i32, i32
  }
  func.func @transform_3(%arg0: i32) -> (i32, i32) {
    %c0_i32 = arith.constant 0 : i32
    %c0_i32_0 = arith.constant 0 : i32
    %c0_i32_1 = arith.constant 0 : i32
    return %c0_i32, %c0_i32_0 : i32, i32
  }
  func.func @transform_4(%arg0: i32) -> (i32, i32) {
    %c0_i32 = arith.constant 0 : i32
    %c0_i32_0 = arith.constant 0 : i32
    return %arg0, %c0_i32 : i32, i32
  }
}

</mosaic_0001>

<bundles_post_ra>
// kernel: conv2d_bn_act.1
= control target key start
LH: loop header
LB: loop body
LE: loop exit
PB: predicated region body
PF: predicated region fallthrough
CT: control target
= control target key end

     0   :  { %9 = vsyncpa [#allocation3], 0  ;;  %s2644_s0 = inlined_call_operand.vmem [shape: bf16[2048,147], index: 0, kind: input, shape index: {}]   ;;  %s2645_s1 = inlined_call_operand.vmem [shape: bf16[147,64], index: 1, kind: input, shape index: {}]   ;;  %s2646_s2 = inlined_call_operand.vmem [shape: f32[1,64], index: 2, kind: input, shape index: {}]   ;;  %s2647_s3 = inlined_call_operand.vmem [shape: f32[1,64], index: 3, kind: input, shape index: {}]   ;;  %s2648_s4 = inlined_call_operand.hbm [shape: bf16[2048,64], index: 4, kind: output, shape index: {}]  }
   0x1   :  { %11 = vsyncpa [#allocation3 + $0x1], 0  ;;  %s2141_s15 = smov 0   ;;  %s2143_s16 = smov 0  }
   0x2   :  { %s2145_s17 = smov 0   ;;  %s2147_s18 = smov 0  }
   0x3 LB: > { %s2162_s19 = sadd.s32 4294967295, %s2109_s18   ;;  %s1627_s20 = sadd.s32 4294967294, %s2109_s18   ;;  %s2109_s18 = sphi %s2147_s18, %s2654_s18   ;;  %s2105_s17 = sphi %s2145_s17, %s2653_s17   ;;  %s2101_s16 = sphi %s2143_s16, %s2652_s16   ;;  %s2097_s15 = sphi %s2141_s15, %s2651_s15  }
   0x4   : > { %s2166_s21 = sadd.s32 1, %s2109_s18   ;;  %s113_s22 = sadd.s32 1, %s2105_s17 }
   0x5   : > { %s110_s23 = ssub.s32 %s2109_s18, %s2166_s21  ;;  %p123_p0 = scmp.ne.s32.totalorder %s2105_s17, %s2101_s16 }
   0x6   : > { %p111_p1 = scmp.eq.s32.totalorder %s110_s23, 0  ;;  %p124_p2 = scmp.eq.s32.totalorder %s2162_s19, 3 }
   0x7   : > { %p129_p3 = scmp.ne.s32.totalorder %s2101_s16, %s2097_s15  ;;  %p130_p4 = scmp.eq.s32.totalorder %s1627_s20, 3 }
   0x8   : > { %s2177_s24 = scalar_select %p111_p1, %s2105_s17, %s113_s22  }
   0x9   : > { %p2179_p5 = por %p124_p2, %p123_p0  ;;  %p2183_p6 = por %p130_p4, %p129_p3 }
   0xa   : > { %p1630_p7 = scmp.ge.s32.totalorder %s2109_s18, 1  ;;  %p167_p8 = scmp.lt.s32.totalorder %s2109_s18, 5 }
   0xc   : > { %p168_p9 = pnand %p1630_p7, %p167_p8 }
   0xd   : > { %v1941_v0 = vld [vmem:[%s2645_s1] sm:$0xff] (!%p168_p9)   ;;  %v2111_v1 = vmov (!%p168_p9), 0   ;;  %v1942_v2 = vld [vmem:[%s2645_s1 + $0x8] sm:$0xff] (!%p168_p9)   ;;  %v1943_v3 = vld [vmem:[%s2645_s1 + $0x10] sm:$0xff] (!%p168_p9)   ;;  %s1632_s7 = sshll.u32 (!%p168_p9), %s2162_s19, 6  ;;  %vm631_vm0 = vcmask (!%p168_p9), 154624  }
   0xe   : > { %171 = sbr.rel (%p168_p9) target bundleno = 411 (0x19b), region = 36  ;;  %735 = vmatprep.subr.bf16.mxu0 (!%p168_p9), %v2111_v1  ;;  %1878 = vmatprep.subr.bf16.mxu1 (!%p168_p9), %v2111_v1  ;;  %p195_p10 = scmp.lt.s32.totalorder (!%p168_p9), %s1632_s7, 255  ;;  %v1944_v4 = vld [vmem:[%s2645_s1 + $0x18] sm:$0xff] (!%p168_p9)   ;;  %v1945_v5 = vld [vmem:[%s2645_s1 + $0x20] sm:$0xff] (!%p168_p9)   ;;  %v1946_v8 = vld [vmem:[%s2645_s1 + $0x28] sm:$0xff] (!%p168_p9)   ;;  %vm728_vm1 = vcmask (!%p168_p9), 1040384  }
   0xf   : > { %736 = vmatpush1.bf16.msra.mxu0 (!%p168_p9), %v1941_v0  ;;  %1888 = vmatpush1.bf16.msra.mxu1 (!%p168_p9), %v1941_v0  ;;  %v1947_v9 = vld [vmem:[%s2645_s1 + $0x30] sm:$0xff] (!%p168_p9)   ;;  %v1948_v10 = vld [vmem:[%s2645_s1 + $0x38] sm:$0xff] (!%p168_p9)   ;;  %vm729_vm2 = vcmask (!%p168_p9), 1041408   ;;  %v2112_v11 = vmov (!%p168_p9), 65535   ;;  %v1949_v13 = vld [vmem:[%s2645_s1 + $0x40] sm:$0xff] (!%p168_p9)   ;;  %s191_s11 = sand.u32 (!%p168_p9), 1, %s2101_s16  }
  0x10   : > { %737 = vmatprep.subr.bf16.mxu0 (!%p168_p9), %v2111_v1  ;;  %1879 = vmatprep.subr.bf16.mxu1 (!%p168_p9), %v2111_v1  ;;  %v730_v12 = vsel (!%p168_p9), %vm728_vm1, 4294967295, %v2112_v11  ;;  %v1950_v14 = vld [vmem:[%s2645_s1 + $0x48] ss:$0 sps:$4 sm:$0x33] (!%p168_p9)   ;;  %vm1486_vm3 = vcmask (!%p168_p9), 519168   ;;  %s1877_s22 = sshll.u32 (!%p168_p9), %s2162_s19, 12 }
  0x11   : > { %v731_v15 = vsel (!%p168_p9), %vm729_vm2, %v730_v12, 0  ;;  %s2589_s29 = scalar_lea.hbm (!%p168_p9), %s2648_s4, %s1877_s22  ;;  %s2603_s19 = scalar_lea.sflag (!%p168_p9), [#allocation3], %s191_s11 }
  0x12   : > { %v733_v16 = vand.u32 (!%p168_p9), %v1950_v14, %v731_v15  ;;  %v2324_v15 = vld [vmem:[%s2646_s2] ss:$0 sm:$0xff] (!%p168_p9)  ;;  %s2113_s5 = smov (!%p168_p9), [#allocation2]  }
  0x13   : > { %738 = vmatpush1.bf16.msra.mxu0 (!%p168_p9), %v1942_v2  ;;  %1889 = vmatpush1.bf16.msra.mxu1 (!%p168_p9), %v1942_v2  ;;  %s2051_s6 = sshll.u32 (!%p168_p9), %s2113_s5, 4  ;;  %s2052_s6 = int_to_ptr.vmem [resolvable:$false] %s2051_s6 }
  0x14   : > { %739 = vmatprep.subr.bf16.mxu0 (!%p168_p9), %v2111_v1  ;;  %1880 = vmatprep.subr.bf16.mxu1 (!%p168_p9), %v2111_v1 }
  0x15   : > { %s2656_s7 = smov (!%p195_p10, %s1632_s7), 255 }
  0x16   : > { %s1812_s10 = sshll.u32 %s2656_s7, 3  ;;  %s2053_s7 = scalar_lea.vmem %s2052_s6, 8192 }
  0x17   : > { %740 = vmatpush1.bf16.msra.mxu0 %v1943_v3  ;;  %1890 = vmatpush1.bf16.msra.mxu1 %v1943_v3  ;;  %s2205_s13 = scalar_lea.vmem %s2644_s0, %s1812_s10 }
  0x18   : > { %741 = vmatprep.subr.bf16.mxu0 %v2111_v1  ;;  %1881 = vmatprep.subr.bf16.mxu1 %v2111_v1  ;;  %v1953_v6 = vld [vmem:[%s2205_s13 + $0x4] ss:$8 sps:$4 sm:$0xff]   ;;  %v1951_v17 = vld [vmem:[%s2205_s13] ss:$8 sps:$4 sm:$0xff]   ;;  %v1957_v19 = vld [vmem:[%s2205_s13 + $0x14] ss:$8 sps:$4 sm:$0xff]  }
  0x19   : > { %v1956_v7 = vld [vmem:[%s2205_s13 + $0x104] ss:$8 sps:$4 sm:$0xff]   ;;  %1709 = vmatprep.mubr.msk.bf16.mxu0 %vm631_vm0, %v1953_v6  ;;  %v1954_v18 = vld [vmem:[%s2205_s13 + $0x100] ss:$8 sps:$4 sm:$0xff]   ;;  %v1959_v20 = vld [vmem:[%s2205_s13 + $0x114] ss:$8 sps:$4 sm:$0xff]  }
  0x1a   : > { %1725 = vmatprep.mubr.msk.bf16.mxu1 %vm631_vm0, %v1956_v7  ;;  %v1961_v21 = vld [vmem:[%s2205_s13 + $0x10] ss:$8 sps:$4 sm:$0xff]   ;;  %v1963_v23 = vld [vmem:[%s2205_s13 + $0x24] ss:$8 sps:$4 sm:$0xff]   ;;  %v1967_v25 = vld [vmem:[%s2205_s13 + $0x20] ss:$8 sps:$4 sm:$0xff]  }
  0x1b   : > { %742 = vmatpush1.bf16.msra.mxu0 %v1944_v4  ;;  %1891 = vmatpush1.bf16.msra.mxu1 %v1944_v4  ;;  %v1962_v22 = vld [vmem:[%s2205_s13 + $0x110] ss:$8 sps:$4 sm:$0xff]   ;;  %v1965_v24 = vld [vmem:[%s2205_s13 + $0x124] ss:$8 sps:$4 sm:$0xff]   ;;  %v1968_v26 = vld [vmem:[%s2205_s13 + $0x120] ss:$8 sps:$4 sm:$0xff]  }
  0x1c   : > { %743 = vmatprep.subr.bf16.mxu0 %v2111_v1  ;;  %1882 = vmatprep.subr.bf16.mxu1 %v2111_v1  ;;  %v1969_v27 = vld [vmem:[%s2205_s13 + $0x34] ss:$8 sps:$4 sm:$0xff]   ;;  %v1973_v29 = vld [vmem:[%s2205_s13 + $0x30] ss:$8 sps:$4 sm:$0xff]   ;;  %v1975_v31 = vld [vmem:[%s2205_s13 + $0x44] ss:$8 sps:$4 sm:$0xff]  }
  0x1d   : > { %v1971_v28 = vld [vmem:[%s2205_s13 + $0x134] ss:$8 sps:$4 sm:$0xff]   ;;  %v1974_v30 = vld [vmem:[%s2205_s13 + $0x130] ss:$8 sps:$4 sm:$0xff]   ;;  %v1977_v32 = vld [vmem:[%s2205_s13 + $0x144] ss:$8 sps:$4 sm:$0xff]  }
  0x1e   : > { %v1979_v33 = vld [vmem:[%s2205_s13 + $0x40] ss:$8 sps:$4 sm:$0xff]   ;;  %v1981_v35 = vld [vmem:[%s2205_s13 + $0x54] ss:$8 sps:$4 sm:$0xff]   ;;  %v1985_v37 = vld [vmem:[%s2205_s13 + $0x50] ss:$8 sps:$4 sm:$0xff]  }
  0x1f   : > { %744 = vmatpush1.bf16.msra.mxu0 %v1945_v5  ;;  %1892 = vmatpush1.bf16.msra.mxu1 %v1945_v5  ;;  %v1980_v34 = vld [vmem:[%s2205_s13 + $0x140] ss:$8 sps:$4 sm:$0xff]   ;;  %v1983_v36 = vld [vmem:[%s2205_s13 + $0x154] ss:$8 sps:$4 sm:$0xff]   ;;  %v1986_v38 = vld [vmem:[%s2205_s13 + $0x150] ss:$8 sps:$4 sm:$0xff]  }
  0x20   : > { %745 = vmatprep.subr.bf16.mxu0 %v2111_v1  ;;  %1883 = vmatprep.subr.bf16.mxu1 %v2111_v1  ;;  %v1987_v39 = vld [vmem:[%s2205_s13 + $0x64] ss:$8 sps:$4 sm:$0xff]   ;;  %v1991_v41 = vld [vmem:[%s2205_s13 + $0x60] ss:$8 sps:$4 sm:$0xff]   ;;  %v1993_v43 = vld [vmem:[%s2205_s13 + $0x74] ss:$8 sps:$4 sm:$0xff]  }
  0x21   : > { %v1989_v40 = vld [vmem:[%s2205_s13 + $0x164] ss:$8 sps:$4 sm:$0xff]   ;;  %v1992_v42 = vld [vmem:[%s2205_s13 + $0x160] ss:$8 sps:$4 sm:$0xff]   ;;  %v1995_v44 = vld [vmem:[%s2205_s13 + $0x174] ss:$8 sps:$4 sm:$0xff]  }
  0x22   : > { %v1997_v45 = vld [vmem:[%s2205_s13 + $0x70] ss:$8 sps:$4 sm:$0xff]   ;;  %v1999_v47 = vld [vmem:[%s2205_s13 + $0x84] ss:$8 sps:$4 sm:$0xff]   ;;  %v2003_v49 = vld [vmem:[%s2205_s13 + $0x80] ss:$8 sps:$4 sm:$0xff]  }
  0x23   : > { %746 = vmatpush1.bf16.msra.mxu0 %v1946_v8  ;;  %1893 = vmatpush1.bf16.msra.mxu1 %v1946_v8  ;;  %v1998_v46 = vld [vmem:[%s2205_s13 + $0x170] ss:$8 sps:$4 sm:$0xff]   ;;  %v2001_v48 = vld [vmem:[%s2205_s13 + $0x184] ss:$8 sps:$4 sm:$0xff]   ;;  %v2004_v50 = vld [vmem:[%s2205_s13 + $0x180] ss:$8 sps:$4 sm:$0xff]  }
  0x24   : > { %747 = vmatprep.subr.bf16.mxu0 %v2111_v1  ;;  %1884 = vmatprep.subr.bf16.mxu1 %v2111_v1  ;;  %v2005_v51 = vld [vmem:[%s2205_s13 + $0x94] ss:$8 sps:$4 sm:$0xff]   ;;  %v2009_v53 = vld [vmem:[%s2205_s13 + $0x90] ss:$8 sps:$4 sm:$0xff]   ;;  %v2011_v55 = vld [vmem:[%s2205_s13 + $0xa4] ss:$8 sps:$4 sm:$0xff]  }
  0x25   : > { %v2007_v52 = vld [vmem:[%s2205_s13 + $0x194] ss:$8 sps:$4 sm:$0xff]   ;;  %v2010_v54 = vld [vmem:[%s2205_s13 + $0x190] ss:$8 sps:$4 sm:$0xff]   ;;  %v2013_v56 = vld [vmem:[%s2205_s13 + $0x1a4] ss:$8 sps:$4 sm:$0xff]  }
  0x26   : > { %v2015_v57 = vld [vmem:[%s2205_s13 + $0xa0] ss:$8 sps:$4 sm:$0xff]   ;;  %v2017_v59 = vld [vmem:[%s2205_s13 + $0xb4] ss:$8 sps:$4 sm:$0xff]   ;;  %v2021_v61 = vld [vmem:[%s2205_s13 + $0xb0] ss:$8 sps:$4 sm:$0xff]  }
  0x27   : > { %748 = vmatpush1.bf16.msra.mxu0 %v1947_v9  ;;  %1894 = vmatpush1.bf16.msra.mxu1 %v1947_v9  ;;  %v2016_v58 = vld [vmem:[%s2205_s13 + $0x1a0] ss:$8 sps:$4 sm:$0xff]   ;;  %v2019_v60 = vld [vmem:[%s2205_s13 + $0x1b4] ss:$8 sps:$4 sm:$0xff]   ;;  %v2022_v62 = vld [vmem:[%s2205_s13 + $0x1b0] ss:$8 sps:$4 sm:$0xff]  }
  0x28   : > { %749 = vmatprep.subr.bf16.mxu0 %v2111_v1  ;;  %1885 = vmatprep.subr.bf16.mxu1 %v2111_v1  ;;  %v2023_v63 = vld [vmem:[%s2205_s13 + $0xc4] ss:$8 sps:$4 sm:$0xff]   ;;  %v2028_v2 = vld [vmem:[%s2205_s13 + $0x1c0] ss:$8 sps:$4 sm:$0xff]   ;;  %v2029_v3 = vld [vmem:[%s2205_s13 + $0xd4] ss:$8 sps:$4 sm:$0xff]  }
  0x29   : > { %v2025_v0 = vld [vmem:[%s2205_s13 + $0x1c4] ss:$8 sps:$4 sm:$0xff]   ;;  %v2031_v4 = vld [vmem:[%s2205_s13 + $0x1d4] ss:$8 sps:$4 sm:$0xff]   ;;  %v2033_v5 = vld [vmem:[%s2205_s13 + $0xd0] ss:$8 sps:$4 sm:$0xff]  }
  0x2a   : > { %v2034_v6 = vld [vmem:[%s2205_s13 + $0x1d0] ss:$8 sps:$4 sm:$0xff]   ;;  %v2035_v7 = vld [vmem:[%s2205_s13 + $0xe4] ss:$8 sps:$4 sm:$0xff]   ;;  %v2039_v9 = vld [vmem:[%s2205_s13 + $0xe0] ss:$8 sps:$4 sm:$0xff]  }
  0x2b   : > { %750 = vmatpush1.bf16.msra.mxu0 %v1948_v10  ;;  %1895 = vmatpush1.bf16.msra.mxu1 %v1948_v10  ;;  %v2037_v8 = vld [vmem:[%s2205_s13 + $0x1e4] ss:$8 sps:$4 sm:$0xff]   ;;  %v2040_v10 = vld [vmem:[%s2205_s13 + $0x1e0] ss:$8 sps:$4 sm:$0xff]   ;;  %v2041_v11 = vld [vmem:[%s2205_s13 + $0xf4] ss:$8 sps:$4 sm:$0xff]  }
  0x2c   : > { %751 = vmatprep.subr.bf16.mxu0 %v2111_v1  ;;  %1886 = vmatprep.subr.bf16.mxu1 %v2111_v1  ;;  %v2043_v12 = vld [vmem:[%s2205_s13 + $0x1f4] ss:$8 sps:$4 sm:$0xff]   ;;  %v2046_v14 = vld [vmem:[%s2205_s13 + $0x1f0] ss:$8 sps:$4 sm:$0xff]  }
  0x2f   : > { %752 = vmatpush1.bf16.msra.mxu0 %v1949_v13  ;;  %1896 = vmatpush1.bf16.msra.mxu1 %v1949_v13  ;;  %v2045_v13 = vld [vmem:[%s2205_s13 + $0xf0] ss:$8 sps:$4 sm:$0xff]  }
  0x30   : > { %753 = vmatprep.subr.bf16.mxu0 %v2111_v1  ;;  %1887 = vmatprep.subr.bf16.mxu1 %v2111_v1  ;;  %v2027_v1 = vld [vmem:[%s2205_s13 + $0xc0] ss:$8 sps:$4 sm:$0xff]   ;;  %s1631_s13 = sshll.u32 %s191_s11, 8 }
  0x31   : > { %s2342_s20 = scalar_lea.vmem [#allocation2], %s1631_s13 }
  0x32   : > { %s1565_s23 = sshll.u32 %s2342_s20, 4  ;;  %s2591_s23 = int_to_ptr.vmem [resolvable:$true] %s1565_s23 }
  0x33   : > { %754 = vmatpush1.bf16.msra.mxu0 %v733_v16  ;;  %1897 = vmatpush1.bf16.msra.mxu1 %v733_v16  ;;  %s2047_s30 = scalar_lea.vmem %s2591_s23, 4096  ;;  %p2054_p0 = scmp.lt.s32.totalorder %s2591_s23, %s2052_s6 }
  0x34   : > { %p2048_p11 = scmp.ne.s32.totalorder %s2591_s23, %s2047_s30  ;;  %p2055_p1 = scmp.lt.s32.totalorder %s2053_s7, %s2047_s30 }
  0x36   : > { %768 = vmatmul.mubr.bf16.vlgmr.msra.gmra.mrb[0].mxu0 %v1951_v17  ;;  %896 = vmatmul.mubr.bf16.vlgmr.msra.gmra.mrb[0].mxu1 %v1954_v18  ;;  %v2330_v17 = vld [vmem:[%s2647_s3] ss:$0 sm:$0xff]  ;;  %p2049_p12 = pnand %p2048_p11, %p2179_p5  ;;  %p2056_p2 = por %p2055_p1, %p2054_p0 }
  0x37   : > { %1710 = vmatprep.mubr.msk.bf16.mxu0 %vm631_vm0, %v1957_v19  ;;  %1726 = vmatprep.mubr.msk.bf16.mxu1 %vm631_vm0, %v1959_v20 }
  0x38   : > { %p2050_p13 = pneg %p2049_p12 }
  0x3a   : > { %p2057_p3 = pnand %p2056_p2, %p2050_p13 }
  0x3e   : > { %776 = vmatmul.mubr.bf16.gmra.mrb[4].mxu0 %v1961_v21  ;;  %904 = vmatmul.mubr.bf16.gmra.mrb[4].mxu1 %v1962_v22 }
  0x3f   : > { %1711 = vmatprep.mubr.msk.bf16.mxu0 %vm631_vm0, %v1963_v23  ;;  %1727 = vmatprep.mubr.msk.bf16.mxu1 %vm631_vm0, %v1965_v24 }
  0x46   : > { %784 = vmatmul.mubr.bf16.gmra.mrb[8].mxu0 %v1967_v25  ;;  %912 = vmatmul.mubr.bf16.gmra.mrb[8].mxu1 %v1968_v26 }
  0x47   : > { %1712 = vmatprep.mubr.msk.bf16.mxu0 %vm631_vm0, %v1969_v27  ;;  %1728 = vmatprep.mubr.msk.bf16.mxu1 %vm631_vm0, %v1971_v28 }
  0x4e   : > { %792 = vmatmul.mubr.bf16.gmra.mrb[12].mxu0 %v1973_v29  ;;  %920 = vmatmul.mubr.bf16.gmra.mrb[12].mxu1 %v1974_v30 }
  0x4f   : > { %1713 = vmatprep.mubr.msk.bf16.mxu0 %vm631_vm0, %v1975_v31  ;;  %1729 = vmatprep.mubr.msk.bf16.mxu1 %vm631_vm0, %v1977_v32 }
  0x56   : > { %800 = vmatmul.mubr.bf16.gmra.mrb[16].mxu0 %v1979_v33  ;;  %928 = vmatmul.mubr.bf16.gmra.mrb[16].mxu1 %v1980_v34 }
  0x57   : > { %1714 = vmatprep.mubr.msk.bf16.mxu0 %vm631_vm0, %v1981_v35  ;;  %1730 = vmatprep.mubr.msk.bf16.mxu1 %vm631_vm0, %v1983_v36 }
  0x5e   : > { %808 = vmatmul.mubr.bf16.gmra.mrb[20].mxu0 %v1985_v37  ;;  %936 = vmatmul.mubr.bf16.gmra.mrb[20].mxu1 %v1986_v38 }
  0x5f   : > { %1715 = vmatprep.mubr.msk.bf16.mxu0 %vm631_vm0, %v1987_v39  ;;  %1731 = vmatprep.mubr.msk.bf16.mxu1 %vm631_vm0, %v1989_v40 }
  0x66   : > { %816 = vmatmul.mubr.bf16.gmra.mrb[24].mxu0 %v1991_v41  ;;  %944 = vmatmul.mubr.bf16.gmra.mrb[24].mxu1 %v1992_v42 }
  0x67   : > { %1716 = vmatprep.mubr.msk.bf16.mxu0 %vm631_vm0, %v1993_v43  ;;  %1732 = vmatprep.mubr.msk.bf16.mxu1 %vm631_vm0, %v1995_v44 }
  0x6e   : > { %824 = vmatmul.mubr.bf16.gmra.mrb[28].mxu0 %v1997_v45  ;;  %952 = vmatmul.mubr.bf16.gmra.mrb[28].mxu1 %v1998_v46 }
  0x6f   : > { %1717 = vmatprep.mubr.msk.bf16.mxu0 %vm631_vm0, %v1999_v47  ;;  %1733 = vmatprep.mubr.msk.bf16.mxu1 %vm631_vm0, %v2001_v48 }
  0x76   : > { %832 = vmatmul.mubr.bf16.gmra.mrb[32].mxu0 %v2003_v49  ;;  %960 = vmatmul.mubr.bf16.gmra.mrb[32].mxu1 %v2004_v50 }
  0x77   : > { %1718 = vmatprep.mubr.msk.bf16.mxu0 %vm631_vm0, %v2005_v51  ;;  %1734 = vmatprep.mubr.msk.bf16.mxu1 %vm631_vm0, %v2007_v52 }
  0x7e   : > { %840 = vmatmul.mubr.bf16.gmra.mrb[36].mxu0 %v2009_v53  ;;  %968 = vmatmul.mubr.bf16.gmra.mrb[36].mxu1 %v2010_v54 }
  0x7f   : > { %1719 = vmatprep.mubr.msk.bf16.mxu0 %vm631_vm0, %v2011_v55  ;;  %1735 = vmatprep.mubr.msk.bf16.mxu1 %vm631_vm0, %v2013_v56 }
  0x86   : > { %848 = vmatmul.mubr.bf16.gmra.mrb[40].mxu0 %v2015_v57  ;;  %976 = vmatmul.mubr.bf16.gmra.mrb[40].mxu1 %v2016_v58 }
  0x87   : > { %1720 = vmatprep.mubr.msk.bf16.mxu0 %vm631_vm0, %v2017_v59  ;;  %1736 = vmatprep.mubr.msk.bf16.mxu1 %vm631_vm0, %v2019_v60 }
  0x8e   : > { %856 = vmatmul.mubr.bf16.gmra.mrb[44].mxu0 %v2021_v61  ;;  %984 = vmatmul.mubr.bf16.gmra.mrb[44].mxu1 %v2022_v62 }
  0x8f   : > { %1721 = vmatprep.mubr.msk.bf16.mxu0 %vm631_vm0, %v2023_v63  ;;  %1737 = vmatprep.mubr.msk.bf16.mxu1 %vm631_vm0, %v2025_v0 }
  0x96   : > { %864 = vmatmul.mubr.bf16.gmra.mrb[48].mxu0 %v2027_v1  ;;  %992 = vmatmul.mubr.bf16.gmra.mrb[48].mxu1 %v2028_v2 }
  0x97   : > { %1722 = vmatprep.mubr.msk.bf16.mxu0 %vm631_vm0, %v2029_v3  ;;  %1738 = vmatprep.mubr.msk.bf16.mxu1 %vm631_vm0, %v2031_v4 }
  0x9e   : > { %872 = vmatmul.mubr.bf16.gmra.mrb[52].mxu0 %v2033_v5  ;;  %1000 = vmatmul.mubr.bf16.gmra.mrb[52].mxu1 %v2034_v6 }
  0x9f   : > { %1723 = vmatprep.mubr.msk.bf16.mxu0 %vm631_vm0, %v2035_v7  ;;  %1739 = vmatprep.mubr.msk.bf16.mxu1 %vm631_vm0, %v2037_v8 }
  0xa6   : > { %880 = vmatmul.mubr.bf16.gmra.mrb[56].mxu0 %v2039_v9  ;;  %1008 = vmatmul.mubr.bf16.gmra.mrb[56].mxu1 %v2040_v10 }
  0xa7   : > { %1724 = vmatprep.mubr.msk.bf16.mxu0 %vm631_vm0, %v2041_v11  ;;  %1740 = vmatprep.mubr.msk.bf16.mxu1 %vm631_vm0, %v2043_v12 }
  0xae   : > { %888 = vmatmul.mubr.bf16.gmra.mrb[60].mxu0 %v2045_v13  ;;  %1016 = vmatmul.mubr.bf16.gmra.mrb[60].mxu1 %v2046_v14 }
 0x109   : > { %v769_v16 = vpop.f32.mrb[0].mxu0  ;;  %v897_v18 = vpop.f32.mrb[0].mxu1 }
 0x10a   : > { %v1031_v19 = vmul.f32 %v2324_v15, %v769_v16  ;;  %v1063_v20 = vmul.f32 %v2324_v15, %v897_v18  ;;  %v771_v21 = vpop.f32.mrb[1].mxu0  ;;  %v899_v22 = vpop.f32.mrb[1].mxu1 }
 0x10b   : > { %v772_v23 = vpop.f32.mrb[2].mxu0  ;;  %v900_v24 = vpop.f32.mrb[2].mxu1 }
 0x10c   : > { %v1102_v25 = vadd.f32 %v2330_v17, %v1031_v19  ;;  %v1134_v26 = vadd.f32 %v2330_v17, %v1063_v20  ;;  %v1032_v27 = vmul.f32 %v2324_v15, %v772_v23  ;;  %v1064_v28 = vmul.f32 %v2324_v15, %v900_v24  ;;  %v774_v29 = vpop.f32.mrb[3].mxu0  ;;  %v902_v30 = vpop.f32.mrb[3].mxu1 }
 0x10e   : > { %v1166_v31 = vmax.f32 %v1102_v25, 0.0  ;;  %v1198_v32 = vmax.f32 %v1134_v26, 0.0  ;;  %v1103_v33 = vadd.f32 %v2330_v17, %v1032_v27  ;;  %v1135_v34 = vadd.f32 %v2330_v17, %v1064_v28 }
 0x110   : > { %v1813_v35 = vpack.c.bf16 %v1166_v31, %v1166_v31  ;;  %v1845_v36 = vpack.c.bf16 %v1198_v32, %v1198_v32  ;;  %v1167_v37 = vmax.f32 %v1103_v33, 0.0  ;;  %v1199_v38 = vmax.f32 %v1135_v34, 0.0 }
 0x111   : > { %v777_v39 = vpop.f32.mrb[4].mxu0  ;;  %v905_v40 = vpop.f32.mrb[4].mxu1 }
 0x112   : > { %1487 = vst.msk [vmem:[%s2342_s20] sm:$0xf] %vm1486_vm3, %v1813_v35  ;;  %1519 = vst.msk [vmem:[%s2342_s20 + $0x80] sm:$0xf] %vm1486_vm3, %v1845_v36  ;;  %v1814_v41 = vpack.c.bf16 %v1167_v37, %v1167_v37  ;;  %v1846_v42 = vpack.c.bf16 %v1199_v38, %v1199_v38  ;;  %v1033_v43 = vmul.f32 %v2324_v15, %v777_v39  ;;  %v779_v45 = vpop.f32.mrb[5].mxu0  ;;  %v907_v46 = vpop.f32.mrb[5].mxu1 }
 0x113   : > { %v1065_v44 = vmul.f32 %v2324_v15, %v905_v40  ;;  %v780_v47 = vpop.f32.mrb[6].mxu0  ;;  %v908_v48 = vpop.f32.mrb[6].mxu1 }
 0x114   : > { %1488 = vst.msk [vmem:[%s2342_s20 + $0x4] sm:$0xf] %vm1486_vm3, %v1814_v41  ;;  %1520 = vst.msk [vmem:[%s2342_s20 + $0x84] sm:$0xf] %vm1486_vm3, %v1846_v42  ;;  %v1104_v49 = vadd.f32 %v2330_v17, %v1033_v43  ;;  %v1034_v51 = vmul.f32 %v2324_v15, %v780_v47  ;;  %v1066_v52 = vmul.f32 %v2324_v15, %v908_v48  ;;  %v782_v53 = vpop.f32.mrb[7].mxu0  ;;  %v910_v54 = vpop.f32.mrb[7].mxu1 }
 0x115   : > { %v1136_v50 = vadd.f32 %v2330_v17, %v1065_v44 }
 0x116   : > { %v1168_v55 = vmax.f32 %v1104_v49, 0.0  ;;  %v1105_v57 = vadd.f32 %v2330_v17, %v1034_v51  ;;  %v1137_v58 = vadd.f32 %v2330_v17, %v1066_v52 }
 0x117   : > { %v1200_v56 = vmax.f32 %v1136_v50, 0.0 }
 0x118   : > { %v1815_v59 = vpack.c.bf16 %v1168_v55, %v1168_v55  ;;  %v1169_v61 = vmax.f32 %v1105_v57, 0.0  ;;  %v1201_v62 = vmax.f32 %v1137_v58, 0.0 }
 0x119   : > { %v1847_v60 = vpack.c.bf16 %v1200_v56, %v1200_v56  ;;  %v785_v63 = vpop.f32.mrb[8].mxu0  ;;  %v913_v0 = vpop.f32.mrb[8].mxu1 }
 0x11a   : > { %1489 = vst.msk [vmem:[%s2342_s20 + $0x8] sm:$0xf] %vm1486_vm3, %v1815_v59  ;;  %v1816_v1 = vpack.c.bf16 %v1169_v61, %v1169_v61  ;;  %v1848_v2 = vpack.c.bf16 %v1201_v62, %v1201_v62  ;;  %v1035_v3 = vmul.f32 %v2324_v15, %v785_v63  ;;  %v1067_v4 = vmul.f32 %v2324_v15, %v913_v0  ;;  %v787_v5 = vpop.f32.mrb[9].mxu0  ;;  %v915_v6 = vpop.f32.mrb[9].mxu1 }
 0x11b   : > { %1521 = vst.msk [vmem:[%s2342_s20 + $0x88] sm:$0xf] %vm1486_vm3, %v1847_v60  ;;  %v788_v7 = vpop.f32.mrb[10].mxu0  ;;  %v916_v8 = vpop.f32.mrb[10].mxu1 }
 0x11c   : > { %1490 = vst.msk [vmem:[%s2342_s20 + $0xc] sm:$0xf] %vm1486_vm3, %v1816_v1  ;;  %1522 = vst.msk [vmem:[%s2342_s20 + $0x8c] sm:$0xf] %vm1486_vm3, %v1848_v2  ;;  %v1106_v9 = vadd.f32 %v2330_v17, %v1035_v3  ;;  %v1138_v10 = vadd.f32 %v2330_v17, %v1067_v4  ;;  %v1036_v11 = vmul.f32 %v2324_v15, %v788_v7  ;;  %v790_v13 = vpop.f32.mrb[11].mxu0  ;;  %v918_v14 = vpop.f32.mrb[11].mxu1 }
 0x11d   : > { %v1068_v12 = vmul.f32 %v2324_v15, %v916_v8 }
 0x11e   : > { %v1170_v16 = vmax.f32 %v1106_v9, 0.0  ;;  %v1202_v18 = vmax.f32 %v1138_v10, 0.0  ;;  %v1107_v19 = vadd.f32 %v2330_v17, %v1036_v11 }
 0x11f   : > { %v1139_v20 = vadd.f32 %v2330_v17, %v1068_v12 }
 0x120   : > { %v1817_v21 = vpack.c.bf16 %v1170_v16, %v1170_v16  ;;  %v1849_v22 = vpack.c.bf16 %v1202_v18, %v1202_v18  ;;  %v1171_v23 = vmax.f32 %v1107_v19, 0.0 }
 0x121   : > { %v1203_v24 = vmax.f32 %v1139_v20, 0.0  ;;  %v793_v25 = vpop.f32.mrb[12].mxu0  ;;  %v921_v26 = vpop.f32.mrb[12].mxu1 }
 0x122   : > { %1491 = vst.msk [vmem:[%s2342_s20 + $0x10] sm:$0xf] %vm1486_vm3, %v1817_v21  ;;  %1523 = vst.msk [vmem:[%s2342_s20 + $0x90] sm:$0xf] %vm1486_vm3, %v1849_v22  ;;  %v1818_v27 = vpack.c.bf16 %v1171_v23, %v1171_v23  ;;  %v1037_v29 = vmul.f32 %v2324_v15, %v793_v25  ;;  %v1069_v30 = vmul.f32 %v2324_v15, %v921_v26  ;;  %v795_v31 = vpop.f32.mrb[13].mxu0  ;;  %v923_v32 = vpop.f32.mrb[13].mxu1 }
 0x123   : > { %v1850_v28 = vpack.c.bf16 %v1203_v24, %v1203_v24  ;;  %v796_v33 = vpop.f32.mrb[14].mxu0  ;;  %v924_v34 = vpop.f32.mrb[14].mxu1 }
 0x124   : > { %1492 = vst.msk [vmem:[%s2342_s20 + $0x14] sm:$0xf] %vm1486_vm3, %v1818_v27  ;;  %v1108_v35 = vadd.f32 %v2330_v17, %v1037_v29  ;;  %v1140_v36 = vadd.f32 %v2330_v17, %v1069_v30  ;;  %v1038_v37 = vmul.f32 %v2324_v15, %v796_v33  ;;  %v1070_v38 = vmul.f32 %v2324_v15, %v924_v34  ;;  %v798_v39 = vpop.f32.mrb[15].mxu0  ;;  %v926_v40 = vpop.f32.mrb[15].mxu1 }
 0x125   : > { %1524 = vst.msk [vmem:[%s2342_s20 + $0x94] sm:$0xf] %vm1486_vm3, %v1850_v28 }
 0x126   : > { %v1172_v41 = vmax.f32 %v1108_v35, 0.0  ;;  %v1204_v42 = vmax.f32 %v1140_v36, 0.0  ;;  %v1109_v43 = vadd.f32 %v2330_v17, %v1038_v37  ;;  %v1141_v44 = vadd.f32 %v2330_v17, %v1070_v38 }
 0x128   : > { %v1819_v45 = vpack.c.bf16 %v1172_v41, %v1172_v41  ;;  %v1851_v46 = vpack.c.bf16 %v1204_v42, %v1204_v42  ;;  %v1173_v47 = vmax.f32 %v1109_v43, 0.0  ;;  %v1205_v48 = vmax.f32 %v1141_v44, 0.0 }
 0x129   : > { %v801_v49 = vpop.f32.mrb[16].mxu0  ;;  %v929_v50 = vpop.f32.mrb[16].mxu1 }
 0x12a   : > { %1493 = vst.msk [vmem:[%s2342_s20 + $0x18] sm:$0xf] %vm1486_vm3, %v1819_v45  ;;  %1525 = vst.msk [vmem:[%s2342_s20 + $0x98] sm:$0xf] %vm1486_vm3, %v1851_v46  ;;  %v1820_v51 = vpack.c.bf16 %v1173_v47, %v1173_v47  ;;  %v1852_v52 = vpack.c.bf16 %v1205_v48, %v1205_v48  ;;  %v1039_v53 = vmul.f32 %v2324_v15, %v801_v49  ;;  %v803_v55 = vpop.f32.mrb[17].mxu0  ;;  %v931_v56 = vpop.f32.mrb[17].mxu1 }
 0x12b   : > { %v1071_v54 = vmul.f32 %v2324_v15, %v929_v50  ;;  %v804_v57 = vpop.f32.mrb[18].mxu0  ;;  %v932_v58 = vpop.f32.mrb[18].mxu1 }
 0x12c   : > { %1494 = vst.msk [vmem:[%s2342_s20 + $0x1c] sm:$0xf] %vm1486_vm3, %v1820_v51  ;;  %1526 = vst.msk [vmem:[%s2342_s20 + $0x9c] sm:$0xf] %vm1486_vm3, %v1852_v52  ;;  %v1110_v59 = vadd.f32 %v2330_v17, %v1039_v53  ;;  %v1040_v61 = vmul.f32 %v2324_v15, %v804_v57  ;;  %v1072_v62 = vmul.f32 %v2324_v15, %v932_v58  ;;  %v806_v63 = vpop.f32.mrb[19].mxu0  ;;  %v934_v0 = vpop.f32.mrb[19].mxu1 }
 0x12d   : > { %v1142_v60 = vadd.f32 %v2330_v17, %v1071_v54 }
 0x12e   : > { %v1174_v1 = vmax.f32 %v1110_v59, 0.0  ;;  %v1111_v3 = vadd.f32 %v2330_v17, %v1040_v61  ;;  %v1143_v4 = vadd.f32 %v2330_v17, %v1072_v62 }
 0x12f   : > { %v1206_v2 = vmax.f32 %v1142_v60, 0.0 }
 0x130   : > { %v1821_v5 = vpack.c.bf16 %v1174_v1, %v1174_v1  ;;  %v1175_v7 = vmax.f32 %v1111_v3, 0.0  ;;  %v1207_v8 = vmax.f32 %v1143_v4, 0.0 }
 0x131   : > { %v1853_v6 = vpack.c.bf16 %v1206_v2, %v1206_v2  ;;  %v809_v9 = vpop.f32.mrb[20].mxu0  ;;  %v937_v10 = vpop.f32.mrb[20].mxu1 }
 0x132   : > { %1495 = vst.msk [vmem:[%s2342_s20 + $0x20] sm:$0xf] %vm1486_vm3, %v1821_v5  ;;  %v1822_v11 = vpack.c.bf16 %v1175_v7, %v1175_v7  ;;  %v1854_v12 = vpack.c.bf16 %v1207_v8, %v1207_v8  ;;  %v1041_v13 = vmul.f32 %v2324_v15, %v809_v9  ;;  %v1073_v14 = vmul.f32 %v2324_v15, %v937_v10  ;;  %v811_v16 = vpop.f32.mrb[21].mxu0  ;;  %v939_v18 = vpop.f32.mrb[21].mxu1 }
 0x133   : > { %1527 = vst.msk [vmem:[%s2342_s20 + $0xa0] sm:$0xf] %vm1486_vm3, %v1853_v6  ;;  %v812_v19 = vpop.f32.mrb[22].mxu0  ;;  %v940_v20 = vpop.f32.mrb[22].mxu1 }
 0x134   : > { %1496 = vst.msk [vmem:[%s2342_s20 + $0x24] sm:$0xf] %vm1486_vm3, %v1822_v11  ;;  %1528 = vst.msk [vmem:[%s2342_s20 + $0xa4] sm:$0xf] %vm1486_vm3, %v1854_v12  ;;  %v1112_v21 = vadd.f32 %v2330_v17, %v1041_v13  ;;  %v1144_v22 = vadd.f32 %v2330_v17, %v1073_v14  ;;  %v1042_v23 = vmul.f32 %v2324_v15, %v812_v19  ;;  %v814_v25 = vpop.f32.mrb[23].mxu0  ;;  %v942_v26 = vpop.f32.mrb[23].mxu1 }
 0x135   : > { %v1074_v24 = vmul.f32 %v2324_v15, %v940_v20 }
 0x136   : > { %v1176_v27 = vmax.f32 %v1112_v21, 0.0  ;;  %v1208_v28 = vmax.f32 %v1144_v22, 0.0  ;;  %v1113_v29 = vadd.f32 %v2330_v17, %v1042_v23 }
 0x137   : > { %v1145_v30 = vadd.f32 %v2330_v17, %v1074_v24 }
 0x138   : > { %v1823_v31 = vpack.c.bf16 %v1176_v27, %v1176_v27  ;;  %v1855_v32 = vpack.c.bf16 %v1208_v28, %v1208_v28  ;;  %v1177_v33 = vmax.f32 %v1113_v29, 0.0 }
 0x139   : > { %v1209_v34 = vmax.f32 %v1145_v30, 0.0  ;;  %v817_v35 = vpop.f32.mrb[24].mxu0  ;;  %v945_v36 = vpop.f32.mrb[24].mxu1 }
 0x13a   : > { %1497 = vst.msk [vmem:[%s2342_s20 + $0x28] sm:$0xf] %vm1486_vm3, %v1823_v31  ;;  %1529 = vst.msk [vmem:[%s2342_s20 + $0xa8] sm:$0xf] %vm1486_vm3, %v1855_v32  ;;  %v1824_v37 = vpack.c.bf16 %v1177_v33, %v1177_v33  ;;  %v1043_v39 = vmul.f32 %v2324_v15, %v817_v35  ;;  %v1075_v40 = vmul.f32 %v2324_v15, %v945_v36  ;;  %v819_v41 = vpop.f32.mrb[25].mxu0  ;;  %v947_v42 = vpop.f32.mrb[25].mxu1 }
 0x13b   : > { %v1856_v38 = vpack.c.bf16 %v1209_v34, %v1209_v34  ;;  %v820_v43 = vpop.f32.mrb[26].mxu0  ;;  %v948_v44 = vpop.f32.mrb[26].mxu1 }
 0x13c   : > { %1498 = vst.msk [vmem:[%s2342_s20 + $0x2c] sm:$0xf] %vm1486_vm3, %v1824_v37  ;;  %v1114_v45 = vadd.f32 %v2330_v17, %v1043_v39  ;;  %v1146_v46 = vadd.f32 %v2330_v17, %v1075_v40  ;;  %v1044_v47 = vmul.f32 %v2324_v15, %v820_v43  ;;  %v1076_v48 = vmul.f32 %v2324_v15, %v948_v44  ;;  %v822_v49 = vpop.f32.mrb[27].mxu0  ;;  %v950_v50 = vpop.f32.mrb[27].mxu1 }
 0x13d   : > { %1530 = vst.msk [vmem:[%s2342_s20 + $0xac] sm:$0xf] %vm1486_vm3, %v1856_v38 }
 0x13e   : > { %v1178_v51 = vmax.f32 %v1114_v45, 0.0  ;;  %v1210_v52 = vmax.f32 %v1146_v46, 0.0  ;;  %v1115_v53 = vadd.f32 %v2330_v17, %v1044_v47  ;;  %v1147_v54 = vadd.f32 %v2330_v17, %v1076_v48 }
 0x140   : > { %v1825_v55 = vpack.c.bf16 %v1178_v51, %v1178_v51  ;;  %v1857_v56 = vpack.c.bf16 %v1210_v52, %v1210_v52  ;;  %v1179_v57 = vmax.f32 %v1115_v53, 0.0  ;;  %v1211_v58 = vmax.f32 %v1147_v54, 0.0 }
 0x141   : > { %v825_v59 = vpop.f32.mrb[28].mxu0  ;;  %v953_v60 = vpop.f32.mrb[28].mxu1 }
 0x142   : > { %1499 = vst.msk [vmem:[%s2342_s20 + $0x30] sm:$0xf] %vm1486_vm3, %v1825_v55  ;;  %1531 = vst.msk [vmem:[%s2342_s20 + $0xb0] sm:$0xf] %vm1486_vm3, %v1857_v56  ;;  %v1826_v61 = vpack.c.bf16 %v1179_v57, %v1179_v57  ;;  %v1858_v62 = vpack.c.bf16 %v1211_v58, %v1211_v58  ;;  %v1045_v63 = vmul.f32 %v2324_v15, %v825_v59  ;;  %v827_v1 = vpop.f32.mrb[29].mxu0  ;;  %v955_v2 = vpop.f32.mrb[29].mxu1 }
 0x143   : > { %v1077_v0 = vmul.f32 %v2324_v15, %v953_v60  ;;  %v828_v3 = vpop.f32.mrb[30].mxu0  ;;  %v956_v4 = vpop.f32.mrb[30].mxu1 }
 0x144   : > { %1500 = vst.msk [vmem:[%s2342_s20 + $0x34] sm:$0xf] %vm1486_vm3, %v1826_v61  ;;  %1532 = vst.msk [vmem:[%s2342_s20 + $0xb4] sm:$0xf] %vm1486_vm3, %v1858_v62  ;;  %v1116_v5 = vadd.f32 %v2330_v17, %v1045_v63  ;;  %v1046_v7 = vmul.f32 %v2324_v15, %v828_v3  ;;  %v1078_v8 = vmul.f32 %v2324_v15, %v956_v4  ;;  %v830_v9 = vpop.f32.mrb[31].mxu0  ;;  %v958_v10 = vpop.f32.mrb[31].mxu1 }
 0x145   : > { %v1148_v6 = vadd.f32 %v2330_v17, %v1077_v0 }
 0x146   : > { %v1180_v11 = vmax.f32 %v1116_v5, 0.0  ;;  %v1117_v13 = vadd.f32 %v2330_v17, %v1046_v7  ;;  %v1149_v14 = vadd.f32 %v2330_v17, %v1078_v8 }
 0x147   : > { %v1212_v12 = vmax.f32 %v1148_v6, 0.0 }
 0x148   : > { %v1827_v16 = vpack.c.bf16 %v1180_v11, %v1180_v11  ;;  %v1181_v19 = vmax.f32 %v1117_v13, 0.0  ;;  %v1213_v20 = vmax.f32 %v1149_v14, 0.0 }
 0x149   : > { %v1859_v18 = vpack.c.bf16 %v1212_v12, %v1212_v12  ;;  %v833_v21 = vpop.f32.mrb[32].mxu0  ;;  %v961_v22 = vpop.f32.mrb[32].mxu1 }
 0x14a   : > { %1501 = vst.msk [vmem:[%s2342_s20 + $0x38] sm:$0xf] %vm1486_vm3, %v1827_v16  ;;  %v1828_v23 = vpack.c.bf16 %v1181_v19, %v1181_v19  ;;  %v1860_v24 = vpack.c.bf16 %v1213_v20, %v1213_v20  ;;  %v1047_v25 = vmul.f32 %v2324_v15, %v833_v21  ;;  %v1079_v26 = vmul.f32 %v2324_v15, %v961_v22  ;;  %v835_v27 = vpop.f32.mrb[33].mxu0  ;;  %v963_v28 = vpop.f32.mrb[33].mxu1 }
 0x14b   : > { %1533 = vst.msk [vmem:[%s2342_s20 + $0xb8] sm:$0xf] %vm1486_vm3, %v1859_v18  ;;  %v836_v29 = vpop.f32.mrb[34].mxu0  ;;  %v964_v30 = vpop.f32.mrb[34].mxu1 }
 0x14c   : > { %1502 = vst.msk [vmem:[%s2342_s20 + $0x3c] sm:$0xf] %vm1486_vm3, %v1828_v23  ;;  %1534 = vst.msk [vmem:[%s2342_s20 + $0xbc] sm:$0xf] %vm1486_vm3, %v1860_v24  ;;  %v1118_v31 = vadd.f32 %v2330_v17, %v1047_v25  ;;  %v1150_v32 = vadd.f32 %v2330_v17, %v1079_v26  ;;  %v1048_v33 = vmul.f32 %v2324_v15, %v836_v29  ;;  %v838_v35 = vpop.f32.mrb[35].mxu0  ;;  %v966_v36 = vpop.f32.mrb[35].mxu1 }
 0x14d   : > { %v1080_v34 = vmul.f32 %v2324_v15, %v964_v30 }
 0x14e   : > { %v1182_v37 = vmax.f32 %v1118_v31, 0.0  ;;  %v1214_v38 = vmax.f32 %v1150_v32, 0.0  ;;  %v1119_v39 = vadd.f32 %v2330_v17, %v1048_v33 }
 0x14f   : > { %v1151_v40 = vadd.f32 %v2330_v17, %v1080_v34 }
 0x150   : > { %v1829_v41 = vpack.c.bf16 %v1182_v37, %v1182_v37  ;;  %v1861_v42 = vpack.c.bf16 %v1214_v38, %v1214_v38  ;;  %v1183_v43 = vmax.f32 %v1119_v39, 0.0 }
 0x151   : > { %v1215_v44 = vmax.f32 %v1151_v40, 0.0  ;;  %v841_v45 = vpop.f32.mrb[36].mxu0  ;;  %v969_v46 = vpop.f32.mrb[36].mxu1 }
 0x152   : > { %1503 = vst.msk [vmem:[%s2342_s20 + $0x40] sm:$0xf] %vm1486_vm3, %v1829_v41  ;;  %1535 = vst.msk [vmem:[%s2342_s20 + $0xc0] sm:$0xf] %vm1486_vm3, %v1861_v42  ;;  %v1830_v47 = vpack.c.bf16 %v1183_v43, %v1183_v43  ;;  %v1049_v49 = vmul.f32 %v2324_v15, %v841_v45  ;;  %v1081_v50 = vmul.f32 %v2324_v15, %v969_v46  ;;  %v843_v51 = vpop.f32.mrb[37].mxu0  ;;  %v971_v52 = vpop.f32.mrb[37].mxu1 }
 0x153   : > { %v1862_v48 = vpack.c.bf16 %v1215_v44, %v1215_v44  ;;  %v844_v53 = vpop.f32.mrb[38].mxu0  ;;  %v972_v54 = vpop.f32.mrb[38].mxu1 }
 0x154   : > { %1504 = vst.msk [vmem:[%s2342_s20 + $0x44] sm:$0xf] %vm1486_vm3, %v1830_v47  ;;  %v1120_v55 = vadd.f32 %v2330_v17, %v1049_v49  ;;  %v1152_v56 = vadd.f32 %v2330_v17, %v1081_v50  ;;  %v1050_v57 = vmul.f32 %v2324_v15, %v844_v53  ;;  %v1082_v58 = vmul.f32 %v2324_v15, %v972_v54  ;;  %v846_v59 = vpop.f32.mrb[39].mxu0  ;;  %v974_v60 = vpop.f32.mrb[39].mxu1 }
 0x155   : > { %1536 = vst.msk [vmem:[%s2342_s20 + $0xc4] sm:$0xf] %vm1486_vm3, %v1862_v48 }
 0x156   : > { %v1184_v61 = vmax.f32 %v1120_v55, 0.0  ;;  %v1216_v62 = vmax.f32 %v1152_v56, 0.0  ;;  %v1121_v63 = vadd.f32 %v2330_v17, %v1050_v57  ;;  %v1153_v0 = vadd.f32 %v2330_v17, %v1082_v58 }
 0x158   : > { %v1831_v1 = vpack.c.bf16 %v1184_v61, %v1184_v61  ;;  %v1863_v2 = vpack.c.bf16 %v1216_v62, %v1216_v62  ;;  %v1185_v3 = vmax.f32 %v1121_v63, 0.0  ;;  %v1217_v4 = vmax.f32 %v1153_v0, 0.0 }
 0x159   : > { %v849_v5 = vpop.f32.mrb[40].mxu0  ;;  %v977_v6 = vpop.f32.mrb[40].mxu1 }
 0x15a   : > { %1505 = vst.msk [vmem:[%s2342_s20 + $0x48] sm:$0xf] %vm1486_vm3, %v1831_v1  ;;  %1537 = vst.msk [vmem:[%s2342_s20 + $0xc8] sm:$0xf] %vm1486_vm3, %v1863_v2  ;;  %v1832_v7 = vpack.c.bf16 %v1185_v3, %v1185_v3  ;;  %v1864_v8 = vpack.c.bf16 %v1217_v4, %v1217_v4  ;;  %v1051_v9 = vmul.f32 %v2324_v15, %v849_v5  ;;  %v851_v11 = vpop.f32.mrb[41].mxu0  ;;  %v979_v12 = vpop.f32.mrb[41].mxu1 }
 0x15b   : > { %v1083_v10 = vmul.f32 %v2324_v15, %v977_v6  ;;  %v852_v13 = vpop.f32.mrb[42].mxu0  ;;  %v980_v14 = vpop.f32.mrb[42].mxu1 }
 0x15c   : > { %1506 = vst.msk [vmem:[%s2342_s20 + $0x4c] sm:$0xf] %vm1486_vm3, %v1832_v7  ;;  %1538 = vst.msk [vmem:[%s2342_s20 + $0xcc] sm:$0xf] %vm1486_vm3, %v1864_v8  ;;  %v1122_v16 = vadd.f32 %v2330_v17, %v1051_v9  ;;  %v1052_v19 = vmul.f32 %v2324_v15, %v852_v13  ;;  %v1084_v20 = vmul.f32 %v2324_v15, %v980_v14  ;;  %v854_v21 = vpop.f32.mrb[43].mxu0  ;;  %v982_v22 = vpop.f32.mrb[43].mxu1 }
 0x15d   : > { %v1154_v18 = vadd.f32 %v2330_v17, %v1083_v10 }
 0x15e   : > { %v1186_v23 = vmax.f32 %v1122_v16, 0.0  ;;  %v1123_v25 = vadd.f32 %v2330_v17, %v1052_v19  ;;  %v1155_v26 = vadd.f32 %v2330_v17, %v1084_v20 }
 0x15f   : > { %v1218_v24 = vmax.f32 %v1154_v18, 0.0 }
 0x160   : > { %v1833_v27 = vpack.c.bf16 %v1186_v23, %v1186_v23  ;;  %v1187_v29 = vmax.f32 %v1123_v25, 0.0  ;;  %v1219_v30 = vmax.f32 %v1155_v26, 0.0 }
 0x161   : > { %v1865_v28 = vpack.c.bf16 %v1218_v24, %v1218_v24  ;;  %v857_v31 = vpop.f32.mrb[44].mxu0  ;;  %v985_v32 = vpop.f32.mrb[44].mxu1 }
 0x162   : > { %1507 = vst.msk [vmem:[%s2342_s20 + $0x50] sm:$0xf] %vm1486_vm3, %v1833_v27  ;;  %v1834_v33 = vpack.c.bf16 %v1187_v29, %v1187_v29  ;;  %v1866_v34 = vpack.c.bf16 %v1219_v30, %v1219_v30  ;;  %v1053_v35 = vmul.f32 %v2324_v15, %v857_v31  ;;  %v1085_v36 = vmul.f32 %v2324_v15, %v985_v32  ;;  %v859_v37 = vpop.f32.mrb[45].mxu0  ;;  %v987_v38 = vpop.f32.mrb[45].mxu1 }
 0x163   : > { %1539 = vst.msk [vmem:[%s2342_s20 + $0xd0] sm:$0xf] %vm1486_vm3, %v1865_v28  ;;  %v860_v39 = vpop.f32.mrb[46].mxu0  ;;  %v988_v40 = vpop.f32.mrb[46].mxu1 }
 0x164   : > { %1508 = vst.msk [vmem:[%s2342_s20 + $0x54] sm:$0xf] %vm1486_vm3, %v1834_v33  ;;  %1540 = vst.msk [vmem:[%s2342_s20 + $0xd4] sm:$0xf] %vm1486_vm3, %v1866_v34  ;;  %v1124_v41 = vadd.f32 %v2330_v17, %v1053_v35  ;;  %v1156_v42 = vadd.f32 %v2330_v17, %v1085_v36  ;;  %v1054_v43 = vmul.f32 %v2324_v15, %v860_v39  ;;  %v862_v45 = vpop.f32.mrb[47].mxu0  ;;  %v990_v46 = vpop.f32.mrb[47].mxu1 }
 0x165   : > { %v1086_v44 = vmul.f32 %v2324_v15, %v988_v40 }
 0x166   : > { %v1188_v47 = vmax.f32 %v1124_v41, 0.0  ;;  %v1220_v48 = vmax.f32 %v1156_v42, 0.0  ;;  %v1125_v49 = vadd.f32 %v2330_v17, %v1054_v43 }
 0x167   : > { %v1157_v50 = vadd.f32 %v2330_v17, %v1086_v44 }
 0x168   : > { %v1835_v51 = vpack.c.bf16 %v1188_v47, %v1188_v47  ;;  %v1867_v52 = vpack.c.bf16 %v1220_v48, %v1220_v48  ;;  %v1189_v53 = vmax.f32 %v1125_v49, 0.0 }
 0x169   : > { %v1221_v54 = vmax.f32 %v1157_v50, 0.0  ;;  %v865_v55 = vpop.f32.mrb[48].mxu0  ;;  %v993_v56 = vpop.f32.mrb[48].mxu1 }
 0x16a   : > { %1509 = vst.msk [vmem:[%s2342_s20 + $0x58] sm:$0xf] %vm1486_vm3, %v1835_v51  ;;  %1541 = vst.msk [vmem:[%s2342_s20 + $0xd8] sm:$0xf] %vm1486_vm3, %v1867_v52  ;;  %v1836_v57 = vpack.c.bf16 %v1189_v53, %v1189_v53  ;;  %v1055_v59 = vmul.f32 %v2324_v15, %v865_v55  ;;  %v1087_v60 = vmul.f32 %v2324_v15, %v993_v56  ;;  %v867_v61 = vpop.f32.mrb[49].mxu0  ;;  %v995_v62 = vpop.f32.mrb[49].mxu1 }
 0x16b   : > { %v1868_v58 = vpack.c.bf16 %v1221_v54, %v1221_v54  ;;  %v868_v63 = vpop.f32.mrb[50].mxu0  ;;  %v996_v0 = vpop.f32.mrb[50].mxu1 }
 0x16c   : > { %1510 = vst.msk [vmem:[%s2342_s20 + $0x5c] sm:$0xf] %vm1486_vm3, %v1836_v57  ;;  %v1126_v1 = vadd.f32 %v2330_v17, %v1055_v59  ;;  %v1158_v2 = vadd.f32 %v2330_v17, %v1087_v60  ;;  %v1056_v3 = vmul.f32 %v2324_v15, %v868_v63  ;;  %v1088_v4 = vmul.f32 %v2324_v15, %v996_v0  ;;  %v870_v5 = vpop.f32.mrb[51].mxu0  ;;  %v998_v6 = vpop.f32.mrb[51].mxu1 }
 0x16d   : > { %1542 = vst.msk [vmem:[%s2342_s20 + $0xdc] sm:$0xf] %vm1486_vm3, %v1868_v58 }
 0x16e   : > { %v1190_v7 = vmax.f32 %v1126_v1, 0.0  ;;  %v1222_v8 = vmax.f32 %v1158_v2, 0.0  ;;  %v1127_v9 = vadd.f32 %v2330_v17, %v1056_v3  ;;  %v1159_v10 = vadd.f32 %v2330_v17, %v1088_v4 }
 0x170   : > { %v1837_v11 = vpack.c.bf16 %v1190_v7, %v1190_v7  ;;  %v1869_v12 = vpack.c.bf16 %v1222_v8, %v1222_v8  ;;  %v1191_v13 = vmax.f32 %v1127_v9, 0.0  ;;  %v1223_v14 = vmax.f32 %v1159_v10, 0.0 }
 0x171   : > { %v873_v16 = vpop.f32.mrb[52].mxu0  ;;  %v1001_v18 = vpop.f32.mrb[52].mxu1 }
 0x172   : > { %1511 = vst.msk [vmem:[%s2342_s20 + $0x60] sm:$0xf] %vm1486_vm3, %v1837_v11  ;;  %1543 = vst.msk [vmem:[%s2342_s20 + $0xe0] sm:$0xf] %vm1486_vm3, %v1869_v12  ;;  %v1838_v19 = vpack.c.bf16 %v1191_v13, %v1191_v13  ;;  %v1870_v20 = vpack.c.bf16 %v1223_v14, %v1223_v14  ;;  %v1057_v21 = vmul.f32 %v2324_v15, %v873_v16  ;;  %v875_v23 = vpop.f32.mrb[53].mxu0  ;;  %v1003_v24 = vpop.f32.mrb[53].mxu1 }
 0x173   : > { %v1089_v22 = vmul.f32 %v2324_v15, %v1001_v18  ;;  %v876_v25 = vpop.f32.mrb[54].mxu0  ;;  %v1004_v26 = vpop.f32.mrb[54].mxu1 }
 0x174   : > { %1512 = vst.msk [vmem:[%s2342_s20 + $0x64] sm:$0xf] %vm1486_vm3, %v1838_v19  ;;  %1544 = vst.msk [vmem:[%s2342_s20 + $0xe4] sm:$0xf] %vm1486_vm3, %v1870_v20  ;;  %v1128_v27 = vadd.f32 %v2330_v17, %v1057_v21  ;;  %v1058_v29 = vmul.f32 %v2324_v15, %v876_v25  ;;  %v1090_v30 = vmul.f32 %v2324_v15, %v1004_v26  ;;  %v878_v31 = vpop.f32.mrb[55].mxu0  ;;  %v1006_v32 = vpop.f32.mrb[55].mxu1 }
 0x175   : > { %v1160_v28 = vadd.f32 %v2330_v17, %v1089_v22 }
 0x176   : > { %v1192_v33 = vmax.f32 %v1128_v27, 0.0  ;;  %v1129_v35 = vadd.f32 %v2330_v17, %v1058_v29  ;;  %v1161_v36 = vadd.f32 %v2330_v17, %v1090_v30 }
 0x177   : > { %v1224_v34 = vmax.f32 %v1160_v28, 0.0 }
 0x178   : > { %v1839_v37 = vpack.c.bf16 %v1192_v33, %v1192_v33  ;;  %v1193_v39 = vmax.f32 %v1129_v35, 0.0  ;;  %v1225_v40 = vmax.f32 %v1161_v36, 0.0 }
 0x179   : > { %v1871_v38 = vpack.c.bf16 %v1224_v34, %v1224_v34  ;;  %v881_v41 = vpop.f32.mrb[56].mxu0  ;;  %v1009_v42 = vpop.f32.mrb[56].mxu1 }
 0x17a   : > { %1513 = vst.msk [vmem:[%s2342_s20 + $0x68] sm:$0xf] %vm1486_vm3, %v1839_v37  ;;  %v1840_v43 = vpack.c.bf16 %v1193_v39, %v1193_v39  ;;  %v1872_v44 = vpack.c.bf16 %v1225_v40, %v1225_v40  ;;  %v1059_v45 = vmul.f32 %v2324_v15, %v881_v41  ;;  %v1091_v46 = vmul.f32 %v2324_v15, %v1009_v42  ;;  %v883_v47 = vpop.f32.mrb[57].mxu0  ;;  %v1011_v48 = vpop.f32.mrb[57].mxu1 }
 0x17b   : > { %1545 = vst.msk [vmem:[%s2342_s20 + $0xe8] sm:$0xf] %vm1486_vm3, %v1871_v38  ;;  %v884_v49 = vpop.f32.mrb[58].mxu0  ;;  %v1012_v50 = vpop.f32.mrb[58].mxu1 }
 0x17c   : > { %1514 = vst.msk [vmem:[%s2342_s20 + $0x6c] sm:$0xf] %vm1486_vm3, %v1840_v43  ;;  %1546 = vst.msk [vmem:[%s2342_s20 + $0xec] sm:$0xf] %vm1486_vm3, %v1872_v44  ;;  %v1130_v51 = vadd.f32 %v2330_v17, %v1059_v45  ;;  %v1162_v52 = vadd.f32 %v2330_v17, %v1091_v46  ;;  %v1060_v53 = vmul.f32 %v2324_v15, %v884_v49  ;;  %v886_v55 = vpop.f32.mrb[59].mxu0  ;;  %v1014_v56 = vpop.f32.mrb[59].mxu1 }
 0x17d   : > { %v1092_v54 = vmul.f32 %v2324_v15, %v1012_v50 }
 0x17e   : > { %v1194_v57 = vmax.f32 %v1130_v51, 0.0  ;;  %v1226_v58 = vmax.f32 %v1162_v52, 0.0  ;;  %v1131_v59 = vadd.f32 %v2330_v17, %v1060_v53 }
 0x17f   : > { %v1163_v60 = vadd.f32 %v2330_v17, %v1092_v54 }
 0x180   : > { %v1841_v61 = vpack.c.bf16 %v1194_v57, %v1194_v57  ;;  %v1873_v62 = vpack.c.bf16 %v1226_v58, %v1226_v58  ;;  %v1195_v63 = vmax.f32 %v1131_v59, 0.0 }
 0x181   : > { %v1227_v0 = vmax.f32 %v1163_v60, 0.0  ;;  %v889_v1 = vpop.f32.mrb[60].mxu0  ;;  %v1017_v2 = vpop.f32.mrb[60].mxu1 }
 0x182   : > { %1515 = vst.msk [vmem:[%s2342_s20 + $0x70] sm:$0xf] %vm1486_vm3, %v1841_v61  ;;  %1547 = vst.msk [vmem:[%s2342_s20 + $0xf0] sm:$0xf] %vm1486_vm3, %v1873_v62  ;;  %v1842_v3 = vpack.c.bf16 %v1195_v63, %v1195_v63  ;;  %v1061_v5 = vmul.f32 %v2324_v15, %v889_v1  ;;  %v1093_v6 = vmul.f32 %v2324_v15, %v1017_v2  ;;  %v891_v7 = vpop.f32.mrb[61].mxu0  ;;  %v1019_v8 = vpop.f32.mrb[61].mxu1 }
 0x183   : > { %v1874_v4 = vpack.c.bf16 %v1227_v0, %v1227_v0  ;;  %v892_v9 = vpop.f32.mrb[62].mxu0  ;;  %v1020_v10 = vpop.f32.mrb[62].mxu1 }
 0x184   : > { %1516 = vst.msk [vmem:[%s2342_s20 + $0x74] sm:$0xf] %vm1486_vm3, %v1842_v3  ;;  %v1132_v11 = vadd.f32 %v2330_v17, %v1061_v5  ;;  %v1164_v12 = vadd.f32 %v2330_v17, %v1093_v6  ;;  %v1062_v13 = vmul.f32 %v2324_v15, %v892_v9  ;;  %v1094_v14 = vmul.f32 %v2324_v15, %v1020_v10  ;;  %v894_v16 = vpop.f32.mrb[63].mxu0  ;;  %v1022_v18 = vpop.f32.mrb[63].mxu1 }
 0x185   : > { %1548 = vst.msk [vmem:[%s2342_s20 + $0xf4] sm:$0xf] %vm1486_vm3, %v1874_v4 }
 0x186   : > { %v1196_v19 = vmax.f32 %v1132_v11, 0.0  ;;  %v1228_v20 = vmax.f32 %v1164_v12, 0.0  ;;  %v1133_v21 = vadd.f32 %v2330_v17, %v1062_v13  ;;  %v1165_v22 = vadd.f32 %v2330_v17, %v1094_v14 }
 0x188   : > { %v1843_v23 = vpack.c.bf16 %v1196_v19, %v1196_v19  ;;  %v1875_v24 = vpack.c.bf16 %v1228_v20, %v1228_v20  ;;  %v1197_v25 = vmax.f32 %v1133_v21, 0.0  ;;  %v1229_v26 = vmax.f32 %v1165_v22, 0.0 }
 0x18a   : > { %1517 = vst.msk [vmem:[%s2342_s20 + $0x78] sm:$0xf] %vm1486_vm3, %v1843_v23  ;;  %1549 = vst.msk [vmem:[%s2342_s20 + $0xf8] sm:$0xf] %vm1486_vm3, %v1875_v24  ;;  %v1844_v15 = vpack.c.bf16 %v1197_v25, %v1197_v25  ;;  %v1876_v17 = vpack.c.bf16 %v1229_v26, %v1229_v26 }
 0x18c   : > { %1518 = vst.msk [vmem:[%s2342_s20 + $0x7c] sm:$0xf] %vm1486_vm3, %v1844_v15  ;;  %1550 = vst.msk [vmem:[%s2342_s20 + $0xfc] sm:$0xf] %vm1486_vm3, %v1876_v17 }
 0x18d   : > { %2060 = shalt.err (!%p2057_p3)
}
 0x18e   : > { %s2061_s8 = scalar_lea.hbm %s2589_s29, 4096  ;;  %s2065_s11 = scalar_lea.hbm %s2648_s4, 16384 }
 0x18f   : > { %p2062_p4 = scmp.ne.s32.totalorder %s2589_s29, %s2061_s8  ;;  %p2066_p9 = scmp.lt.u32.totalorder %s2589_s29, %s2648_s4 }
 0x190   : > { %p2067_p10 = scmp.lt.u32.totalorder %s2065_s11, %s2061_s8  ;;  %p2069_p12 = scmp.lt.u32.totalorder %s2061_s8, %s2589_s29 }
 0x191   : > { %p2063_p7 = pnand %p2062_p4, %p2179_p5 }
 0x192   : > { %p2068_p11 = por %p2067_p10, %p2066_p9 }
 0x193   : > { %p2064_p8 = pneg %p2063_p7 }
 0x194   : > { %p2070_p13 = por %p2069_p12, %p2068_p11 }
 0x196   : > { %p2071_p0 = pnand %p2070_p13, %p2064_p8 }
 0x198   : > { %2074 = shalt.err (!%p2071_p0)
}
 0x199   : > { %s2114_s13 = smov 64   ;;  %s2115_s20 = smov 4  }
 0x19a   : > { %1898 = dma.vmem_to_hbm [thread:$0]  (%p2179_p5), %s2591_s23, 4096, %s2589_s29, %s2603_s19, %s2114_s13, %s2114_s13, %s2115_s20  }
 0x19b PF: > { %p1904_p1 = scmp.ge.s32.totalorder %s2109_s18, 2  ;;  %s1580_s22 = sand.u32 1, %s2097_s15  }
 0x19c   : > { %s1581_s27 = scalar_lea.sflag [#allocation3], %s1580_s22 }
 0x19d   : > { %p1901_p2 = pnand %p1904_p1, %p2183_p6 }
 0x19f   : > { %2092 = dma.done.wait (!%p1901_p2), %s1581_s27, 4096  }
 0x1a0   : > { %2094 = vsyncadd (!%p1901_p2), %s1581_s27, 4294963200  ;;  %p14_p3 = scmp.ge.s32.totalorder %s2166_s21, 6   ;;  %s2651_s15 = smov %s2101_s16 }
 0x1a1   : > { %s2652_s16 = smov %s2105_s17  ;;  %s2653_s17 = smov %s2177_s24 }
 0x1a2   : > { %s2654_s18 = smov %s2166_s21  ;;  %16 = sbr.rel (!%p14_p3) target bundleno = 3 (0x3), region = 71 }
 0x1a9   :  { %1586 = vsyncpa [#allocation3], 1 }
 0x1aa   :  { %1588 = vsyncpa [#allocation3 + $0x1], 1 }

</bundles_post_ra>
